<compile_context>
chip_gen: v5e
topology: v5e:2x2
jax: 0.10.0
libtpu: 0.0.40
codegen_flags: <defaults>
</compile_context>

<pallas_src>
import jax
import jax.numpy as jnp
from jax.experimental import pallas as pl
from jax.experimental.pallas import tpu as pltpu

EPS = 1e-7  # variance clamp used inside weighted_statistics_pooling
# TODO(synk): weighted_statistics_pooling source not provided; implemented the standard
#             attentive-stats form: concat(weighted mean, weighted std) over time.


def _vec_att_stats_pool_kernel(x_ref, w1_ref, b1_ref, w2_ref, b2_ref, out_ref,
                               m_sc, l_sc, s1_sc, s2_sc):
    # One (batch, time-tile) grid step of streaming attentive statistics pooling.
    #   x_ref  : (1, C, tT)  current batch element, current time tile (native dtype)
    #   w1_ref : (BN, C)     bn_function weight (kernel-size-1 conv, squeezed)
    #   b1_ref : (BN, 1)
    #   w2_ref : (C, BN)     function weight
    #   b2_ref : (C, 1)
    #   out_ref: (1, 2, C)   row 0 = weighted mean, row 1 = weighted std
    #   scratch: online-softmax running state, each (C, 1) f32, persistent over t
    t = pl.program_id(1)

    @pl.when(t == 0)
    def _init():
        m_sc[...] = jnp.full_like(m_sc, -jnp.inf)
        l_sc[...] = jnp.zeros_like(l_sc)
        s1_sc[...] = jnp.zeros_like(s1_sc)
        s2_sc[...] = jnp.zeros_like(s2_sc)

    x = x_ref[0]          # (C, tT), native dtype (bf16 supported end-to-end)
    w1 = w1_ref[...]
    b1 = b1_ref[...]
    w2 = w2_ref[...]
    b2 = b2_ref[...]

    # out = tanh(bn_function(x))  -> (BN, tT)   (MXU, f32 accumulation)
    h = jnp.tanh(jnp.dot(w1, x, preferred_element_type=jnp.float32) + b1)
    # logits = function(out)      -> (C, tT)
    logits = jnp.dot(w2, h, preferred_element_type=jnp.float32) + b2

    # Online softmax over time: rescale running sums, accumulate this tile.
    m_old = m_sc[...]                                              # (C, 1)
    m_new = jnp.maximum(m_old, jnp.max(logits, axis=-1, keepdims=True))
    alpha = jnp.exp(m_old - m_new)                                 # (C, 1)
    e = jnp.exp(logits - m_new)                                    # (C, tT)

    xf = x.astype(jnp.float32)
    xe = xf * e
    l_sc[...] = alpha * l_sc[...] + jnp.sum(e, axis=-1, keepdims=True)
    s1_sc[...] = alpha * s1_sc[...] + jnp.sum(xe, axis=-1, keepdims=True)
    s2_sc[...] = alpha * s2_sc[...] + jnp.sum(xf * xe, axis=-1, keepdims=True)
    m_sc[...] = m_new

    @pl.when(t == pl.num_programs(1) - 1)
    def _finalize():
        # Fold the softmax normalization into the stats (no (C,T) divide anywhere).
        l = l_sc[...]
        inv0 = pl.reciprocal(l, approx=True)        # EUP, rides a free slot
        inv = inv0 * (2.0 - l * inv0)               # one Newton step -> f32 accuracy
        mean = s1_sc[...] * inv                     # (C, 1)
        var = s2_sc[...] * inv - mean * mean
        std = jnp.sqrt(jnp.maximum(var, EPS))
        stats = jnp.concatenate([mean, std], axis=-1)       # (C, 2)
        # Single lane-dense (2, C) store per batch (one small transpose, no per-row writes).
        out_ref[0] = stats.T.astype(out_ref.dtype)


def _pick_time_tile(T: int) -> int:
    for cand in (512, 256, 128):
        if T % cand == 0:
            return cand
    return T  # fall back to a single monolithic time tile


def vec_att_stats_pool(x, w1, b1, w2, b2, *, t_tile=None):
    """x: (B, C, T).  Returns (B, 2*C) = concat([weighted mean, weighted std], dim=1)."""
    B, C, T = x.shape
    BN = w1.shape[0]

    tT = _pick_time_tile(T) if t_tile is None else t_tile
    assert T % tT == 0, "time tile must evenly divide T"
    nT = T // tT

    # Keep x in its native dtype (bf16 halves HBM traffic); weights/bias stay f32.
    b1c = b1.reshape(BN, 1).astype(jnp.float32)
    b2c = b2.reshape(C, 1).astype(jnp.float32)
    w1f = w1.astype(jnp.float32)
    w2f = w2.astype(jnp.float32)

    itemsize = jnp.dtype(x.dtype).itemsize
    # VMEM budget: double-buffered x tile + resident weights/bias/out + f32 temporaries
    # (h, logits, e, x*e) + four (C,1) accumulators.  2x headroom, capped at 64 MiB
    # (v7x physical VMEM).
    est = (2 * C * tT * itemsize                       # x tile, double-buffered
           + 2 * 4 * (BN * C + BN + C * BN + C)        # weights + biases
           + 2 * 4 * 2 * C                             # output block
           + 4 * (BN * tT + 3 * C * tT)                # h, logits, e, x*e
           + 4 * 4 * C)                                # accumulators
    vmem_limit = int(min(64 * 1024 * 1024, max(2 * est, 4 * 1024 * 1024)))

    cost = pl.CostEstimate(
        flops=4 * B * C * BN * T,                      # two 1x1-conv matmuls
        transcendentals=B * T * (C + BN),              # exp over CxT + tanh over BNxT
        bytes_accessed=(B * C * T * itemsize
                        + 4 * (BN * C + C * BN + BN + C)
                        + 4 * B * 2 * C),
    )

    out = pl.pallas_call(
        _vec_att_stats_pool_kernel,
        out_shape=jax.ShapeDtypeStruct((B, 2, C), jnp.float32),
        grid=(B, nT),
        in_specs=[
            pl.BlockSpec((1, C, tT), lambda b, t: (b, 0, t)),   # x streamed over time
            pl.BlockSpec((BN, C), lambda b, t: (0, 0)),         # weights stay resident
            pl.BlockSpec((BN, 1), lambda b, t: (0, 0)),
            pl.BlockSpec((C, BN), lambda b, t: (0, 0)),
            pl.BlockSpec((C, 1), lambda b, t: (0, 0)),
        ],
        out_specs=pl.BlockSpec((1, 2, C), lambda b, t: (b, 0, 0)),  # accumulator over t
        scratch_shapes=[
            pltpu.VMEM((C, 1), jnp.float32),   # running max m
            pltpu.VMEM((C, 1), jnp.float32),   # running sum of e
            pltpu.VMEM((C, 1), jnp.float32),   # running sum of x*e
            pltpu.VMEM((C, 1), jnp.float32),   # running sum of x^2*e
        ],
        compiler_params=pltpu.CompilerParams(
            dimension_semantics=("parallel", "arbitrary"),
            vmem_limit_bytes=vmem_limit,
        ),
        cost_estimate=cost,
    )(x, w1f, b1c, w2f, b2c)

    # (B, 2, C) -> (B, 2*C): [mean | std], exactly like torch.cat(dim=1)
    return out.reshape(B, 2 * C)


def _reference(x, w1, b1, w2, b2):
    xf = x.astype(jnp.float32)
    h = jnp.tanh(jnp.einsum("oc,bct->bot", w1, xf) + b1[None, :, None])
    logits = jnp.einsum("co,bot->bct", w2, h) + b2[None, :, None]
    attn = jax.nn.softmax(logits, axis=-1)
    mean = jnp.sum(xf * attn, axis=-1)
    var = jnp.sum(xf * xf * attn, axis=-1) - mean * mean
    std = jnp.sqrt(jnp.maximum(var, EPS))
    return jnp.concatenate([mean, std], axis=-1)


if __name__ == "__main__":
    key = jax.random.PRNGKey(0)
    kx, kw1, kb1, kw2, kb2, kx2 = jax.random.split(key, 6)

    B, C_IN, BN_CH, T = 2, 16, 8, 32
    x = jax.random.normal(kx, (B, C_IN, T), dtype=jnp.float32)
    # Conv1d(in=C_IN, out=BN_CH, k=1): weight (BN_CH, C_IN, 1) -> squeeze to (BN_CH, C_IN)
    w1 = 0.2 * jax.random.normal(kw1, (BN_CH, C_IN), dtype=jnp.float32)
    b1 = 0.1 * jax.random.normal(kb1, (BN_CH,), dtype=jnp.float32)
    # Conv1d(in=BN_CH, out=C_IN, k=1): weight (C_IN, BN_CH, 1) -> squeeze to (C_IN, BN_CH)
    w2 = 0.2 * jax.random.normal(kw2, (C_IN, BN_CH), dtype=jnp.float32)
    b2 = 0.1 * jax.random.normal(kb2, (C_IN,), dtype=jnp.float32)

    # Case 1: single time tile.
    out = vec_att_stats_pool(x, w1, b1, w2, b2)
    jax.block_until_ready(out)
    ref = _reference(x, w1, b1, w2, b2)
    assert out.shape == (B, 2 * C_IN), out.shape
    assert jnp.allclose(out, ref, atol=1e-4, rtol=1e-4), float(jnp.max(jnp.abs(out - ref)))

    # Case 2: multiple time tiles (exercises the online-softmax streaming accumulator).
    T2 = 256
    x2 = jax.random.normal(kx2, (B, C_IN, T2), dtype=jnp.float32)
    out2 = vec_att_stats_pool(x2, w1, b1, w2, b2, t_tile=128)
    jax.block_until_ready(out2)
    ref2 = _reference(x2, w1, b1, w2, b2)
    assert jnp.allclose(out2, ref2, atol=1e-4, rtol=1e-4), float(jnp.max(jnp.abs(out2 - ref2)))

    print("KERNEL_OK")
</pallas_src>

<mosaic_0001>
module attributes {stable_mosaic.version = 11 : i64} {
  func.func @_vec_att_stats_pool_kernel(%arg0: i32, %arg1: i32, %arg2: memref<1x16x32xf32, #tpu.memory_space<vmem>>, %arg3: memref<8x16xf32, #tpu.memory_space<vmem>>, %arg4: memref<8x1xf32, #tpu.memory_space<vmem>>, %arg5: memref<16x8xf32, #tpu.memory_space<vmem>>, %arg6: memref<16x1xf32, #tpu.memory_space<vmem>>, %arg7: memref<1x2x16xf32, #tpu.memory_space<vmem>>, %arg8: memref<16x1xf32, #tpu.memory_space<vmem>>, %arg9: memref<16x1xf32, #tpu.memory_space<vmem>>, %arg10: memref<16x1xf32, #tpu.memory_space<vmem>>, %arg11: memref<16x1xf32, #tpu.memory_space<vmem>>) attributes {dimension_semantics = [#tpu.dimension_semantics<parallel>, #tpu.dimension_semantics<arbitrary>], iteration_bounds = array<i64: 2, 1>, scalar_prefetch = 0 : i64, scratch_operands = 4 : i64, tpu.core_type = #tpu.core_type<tc>, window_params = [{transform_indices = @transform_0, window_bounds = array<i64: 1, 16, 32>}, {pipeline_mode = #tpu.pipeline_mode<synchronous>, transform_indices = @transform_1, window_bounds = array<i64: 8, 16>}, {pipeline_mode = #tpu.pipeline_mode<synchronous>, transform_indices = @transform_2, window_bounds = array<i64: 8, 1>}, {pipeline_mode = #tpu.pipeline_mode<synchronous>, transform_indices = @transform_3, window_bounds = array<i64: 16, 8>}, {pipeline_mode = #tpu.pipeline_mode<synchronous>, transform_indices = @transform_4, window_bounds = array<i64: 16, 1>}, {transform_indices = @transform_5, window_bounds = array<i64: 1, 2, 16>}]} {
    %c0_i32 = arith.constant 0 : i32
    %0 = arith.cmpi eq, %arg1, %c0_i32 : i32
    %1 = arith.extui %0 : i1 to i32
    %c0_i32_0 = arith.constant 0 : i32
    %2 = arith.cmpi ne, %1, %c0_i32_0 : i32
    scf.if %2 {
      %cst_34 = arith.constant 0xFF800000 : f32
      %49 = vector.broadcast %cst_34 : f32 to vector<16x1xf32>
      %c0_35 = arith.constant 0 : index
      %c0_36 = arith.constant 0 : index
      %50 = vector.load %arg8[%c0_35, %c0_36] : memref<16x1xf32, #tpu.memory_space<vmem>>, vector<16x1xf32>
      tpu.vector_store %arg8[%c0_35, %c0_36], %49 {strides = array<i32>} : memref<16x1xf32, #tpu.memory_space<vmem>>, vector<16x1xf32>,
      %cst_37 = arith.constant 0.000000e+00 : f32
      %51 = vector.broadcast %cst_37 : f32 to vector<16x1xf32>
      %c0_38 = arith.constant 0 : index
      %c0_39 = arith.constant 0 : index
      %52 = vector.load %arg9[%c0_38, %c0_39] : memref<16x1xf32, #tpu.memory_space<vmem>>, vector<16x1xf32>
      tpu.vector_store %arg9[%c0_38, %c0_39], %51 {strides = array<i32>} : memref<16x1xf32, #tpu.memory_space<vmem>>, vector<16x1xf32>,
      %cst_40 = arith.constant 0.000000e+00 : f32
      %53 = vector.broadcast %cst_40 : f32 to vector<16x1xf32>
      %c0_41 = arith.constant 0 : index
      %c0_42 = arith.constant 0 : index
      %54 = vector.load %arg10[%c0_41, %c0_42] : memref<16x1xf32, #tpu.memory_space<vmem>>, vector<16x1xf32>
      tpu.vector_store %arg10[%c0_41, %c0_42], %53 {strides = array<i32>} : memref<16x1xf32, #tpu.memory_space<vmem>>, vector<16x1xf32>,
      %cst_43 = arith.constant 0.000000e+00 : f32
      %55 = vector.broadcast %cst_43 : f32 to vector<16x1xf32>
      %c0_44 = arith.constant 0 : index
      %c0_45 = arith.constant 0 : index
      %56 = vector.load %arg11[%c0_44, %c0_45] : memref<16x1xf32, #tpu.memory_space<vmem>>, vector<16x1xf32>
      tpu.vector_store %arg11[%c0_44, %c0_45], %55 {strides = array<i32>} : memref<16x1xf32, #tpu.memory_space<vmem>>, vector<16x1xf32>,
    } else {
    }
    %c0 = arith.constant 0 : index
    %c0_1 = arith.constant 0 : index
    %c0_2 = arith.constant 0 : index
    %3 = vector.load %arg2[%c0, %c0_1, %c0_2] : memref<1x16x32xf32, #tpu.memory_space<vmem>>, vector<1x16x32xf32>
    %4 = vector.shape_cast %3 : vector<1x16x32xf32> to vector<16x32xf32>
    %c0_3 = arith.constant 0 : index
    %c0_4 = arith.constant 0 : index
    %5 = vector.load %arg3[%c0_3, %c0_4] : memref<8x16xf32, #tpu.memory_space<vmem>>, vector<8x16xf32>
    %c0_5 = arith.constant 0 : index
    %c0_6 = arith.constant 0 : index
    %6 = vector.load %arg4[%c0_5, %c0_6] : memref<8x1xf32, #tpu.memory_space<vmem>>, vector<8x1xf32>
    %c0_7 = arith.constant 0 : index
    %c0_8 = arith.constant 0 : index
    %7 = vector.load %arg5[%c0_7, %c0_8] : memref<16x8xf32, #tpu.memory_space<vmem>>, vector<16x8xf32>
    %c0_9 = arith.constant 0 : index
    %c0_10 = arith.constant 0 : index
    %8 = vector.load %arg6[%c0_9, %c0_10] : memref<16x1xf32, #tpu.memory_space<vmem>>, vector<16x1xf32>
    %cst = arith.constant dense<0.000000e+00> : vector<8x32xf32>
    %9 = tpu.matmul %5, %4, %cst {dimension_numbers = #tpu.dot_dimension_numbers<[1], [0], [0], [1], [0, 0, 1, 1], [], []>} : vector<8x16xf32>, vector<16x32xf32>, vector<8x32xf32> -> vector<8x32xf32>
    %10 = vector.broadcast %6 : vector<8x1xf32> to vector<8x32xf32>
    %11 = arith.addf %9, %10 : vector<8x32xf32>
    %12 = math.tanh %11 : vector<8x32xf32>
    %cst_11 = arith.constant dense<0.000000e+00> : vector<16x32xf32>
    %13 = tpu.matmul %7, %12, %cst_11 {dimension_numbers = #tpu.dot_dimension_numbers<[1], [0], [0], [1], [0, 0, 1, 1], [], []>} : vector<16x8xf32>, vector<8x32xf32>, vector<16x32xf32> -> vector<16x32xf32>
    %14 = vector.broadcast %8 : vector<16x1xf32> to vector<16x32xf32>
    %15 = arith.addf %13, %14 : vector<16x32xf32>
    %c0_12 = arith.constant 0 : index
    %c0_13 = arith.constant 0 : index
    %16 = vector.load %arg8[%c0_12, %c0_13] : memref<16x1xf32, #tpu.memory_space<vmem>>, vector<16x1xf32>
    %cst_14 = arith.constant dense<0xFF800000> : vector<16xf32>
    %17 = vector.multi_reduction <maximumf>, %15, %cst_14 [1] : vector<16x32xf32> to vector<16xf32>
    %18 = vector.shape_cast %17 : vector<16xf32> to vector<16x1xf32>
    %19 = arith.maximumf %16, %18 : vector<16x1xf32>
    %20 = arith.subf %16, %19 : vector<16x1xf32>
    %21 = math.exp %20 : vector<16x1xf32>
    %22 = vector.broadcast %19 : vector<16x1xf32> to vector<16x32xf32>
    %23 = arith.subf %15, %22 : vector<16x32xf32>
    %24 = math.exp %23 : vector<16x32xf32>
    %25 = arith.mulf %4, %24 : vector<16x32xf32>
    %c0_15 = arith.constant 0 : index
    %c0_16 = arith.constant 0 : index
    %26 = vector.load %arg9[%c0_15, %c0_16] : memref<16x1xf32, #tpu.memory_space<vmem>>, vector<16x1xf32>
    %27 = arith.mulf %21, %26 : vector<16x1xf32>
    %cst_17 = arith.constant dense<0.000000e+00> : vector<16xf32>
    %28 = vector.multi_reduction <add>, %24, %cst_17 [1] : vector<16x32xf32> to vector<16xf32>
    %29 = vector.shape_cast %28 : vector<16xf32> to vector<16x1xf32>
    %30 = arith.addf %27, %29 : vector<16x1xf32>
    %c0_18 = arith.constant 0 : index
    %c0_19 = arith.constant 0 : index
    %31 = vector.load %arg9[%c0_18, %c0_19] : memref<16x1xf32, #tpu.memory_space<vmem>>, vector<16x1xf32>
    tpu.vector_store %arg9[%c0_18, %c0_19], %30 {strides = array<i32>} : memref<16x1xf32, #tpu.memory_space<vmem>>, vector<16x1xf32>,
    %c0_20 = arith.constant 0 : index
    %c0_21 = arith.constant 0 : index
    %32 = vector.load %arg10[%c0_20, %c0_21] : memref<16x1xf32, #tpu.memory_space<vmem>>, vector<16x1xf32>
    %33 = arith.mulf %21, %32 : vector<16x1xf32>
    %cst_22 = arith.constant dense<0.000000e+00> : vector<16xf32>
    %34 = vector.multi_reduction <add>, %25, %cst_22 [1] : vector<16x32xf32> to vector<16xf32>
    %35 = vector.shape_cast %34 : vector<16xf32> to vector<16x1xf32>
    %36 = arith.addf %33, %35 : vector<16x1xf32>
    %c0_23 = arith.constant 0 : index
    %c0_24 = arith.constant 0 : index
    %37 = vector.load %arg10[%c0_23, %c0_24] : memref<16x1xf32, #tpu.memory_space<vmem>>, vector<16x1xf32>
    tpu.vector_store %arg10[%c0_23, %c0_24], %36 {strides = array<i32>} : memref<16x1xf32, #tpu.memory_space<vmem>>, vector<16x1xf32>,
    %c0_25 = arith.constant 0 : index
    %c0_26 = arith.constant 0 : index
    %38 = vector.load %arg11[%c0_25, %c0_26] : memref<16x1xf32, #tpu.memory_space<vmem>>, vector<16x1xf32>
    %39 = arith.mulf %21, %38 : vector<16x1xf32>
    %40 = arith.mulf %4, %25 : vector<16x32xf32>
    %cst_27 = arith.constant dense<0.000000e+00> : vector<16xf32>
    %41 = vector.multi_reduction <add>, %40, %cst_27 [1] : vector<16x32xf32> to vector<16xf32>
    %42 = vector.shape_cast %41 : vector<16xf32> to vector<16x1xf32>
    %43 = arith.addf %39, %42 : vector<16x1xf32>
    %c0_28 = arith.constant 0 : index
    %c0_29 = arith.constant 0 : index
    %44 = vector.load %arg11[%c0_28, %c0_29] : memref<16x1xf32, #tpu.memory_space<vmem>>, vector<16x1xf32>
    tpu.vector_store %arg11[%c0_28, %c0_29], %43 {strides = array<i32>} : memref<16x1xf32, #tpu.memory_space<vmem>>, vector<16x1xf32>,
    %c0_30 = arith.constant 0 : index
    %c0_31 = arith.constant 0 : index
    %45 = vector.load %arg8[%c0_30, %c0_31] : memref<16x1xf32, #tpu.memory_space<vmem>>, vector<16x1xf32>
    tpu.vector_store %arg8[%c0_30, %c0_31], %19 {strides = array<i32>} : memref<16x1xf32, #tpu.memory_space<vmem>>, vector<16x1xf32>,
    %c0_i32_32 = arith.constant 0 : i32
    %46 = arith.cmpi eq, %arg1, %c0_i32_32 : i32
    %47 = arith.extui %46 : i1 to i32
    %c0_i32_33 = arith.constant 0 : i32
    %48 = arith.cmpi ne, %47, %c0_i32_33 : i32
    scf.if %48 {
      %c0_34 = arith.constant 0 : index
      %c0_35 = arith.constant 0 : index
      %49 = vector.load %arg9[%c0_34, %c0_35] : memref<16x1xf32, #tpu.memory_space<vmem>>, vector<16x1xf32>
      %50 = tpu.reciprocal %49 {approx = true} : vector<16x1xf32> -> vector<16x1xf32>
      %51 = arith.mulf %49, %50 : vector<16x1xf32>
      %cst_36 = arith.constant 2.000000e+00 : f32
      %52 = vector.broadcast %cst_36 : f32 to vector<16x1xf32>
      %53 = arith.subf %52, %51 : vector<16x1xf32>
      %54 = arith.mulf %50, %53 : vector<16x1xf32>
      %c0_37 = arith.constant 0 : index
      %c0_38 = arith.constant 0 : index
      %55 = vector.load %arg10[%c0_37, %c0_38] : memref<16x1xf32, #tpu.memory_space<vmem>>, vector<16x1xf32>
      %56 = arith.mulf %55, %54 : vector<16x1xf32>
      %c0_39 = arith.constant 0 : index
      %c0_40 = arith.constant 0 : index
      %57 = vector.load %arg11[%c0_39, %c0_40] : memref<16x1xf32, #tpu.memory_space<vmem>>, vector<16x1xf32>
      %58 = arith.mulf %57, %54 : vector<16x1xf32>
      %59 = arith.mulf %56, %56 : vector<16x1xf32>
      %60 = arith.subf %58, %59 : vector<16x1xf32>
      %cst_41 = arith.constant 1.000000e-07 : f32
      %61 = vector.broadcast %cst_41 : f32 to vector<16x1xf32>
      %62 = arith.maximumf %60, %61 : vector<16x1xf32>
      %63 = math.sqrt %62 : vector<16x1xf32>
      %64 = tpu.concatenate %56, %63 in 1 : vector<16x1xf32>, vector<16x1xf32> -> vector<16x2xf32>
      %65 = tpu.transpose %64, [1, 0] : vector<16x2xf32> -> vector<2x16xf32>
      %c0_42 = arith.constant 0 : index
      %c0_43 = arith.constant 0 : index
      %c0_44 = arith.constant 0 : index
      %66 = vector.load %arg7[%c0_42, %c0_43, %c0_44] : memref<1x2x16xf32, #tpu.memory_space<vmem>>, vector<1x2x16xf32>
      %67 = vector.shape_cast %66 : vector<1x2x16xf32> to vector<2x16xf32>
      %68 = vector.shape_cast %65 : vector<2x16xf32> to vector<1x2x16xf32>
      tpu.vector_store %arg7[%c0_42, %c0_43, %c0_44], %68 {strides = array<i32>} : memref<1x2x16xf32, #tpu.memory_space<vmem>>, vector<1x2x16xf32>,
    } else {
    }
    return
  }
  func.func @transform_0(%arg0: i32, %arg1: i32) -> (i32, i32, i32) {
    %c0_i32 = arith.constant 0 : i32
    %c0_i32_0 = arith.constant 0 : i32
    return %arg0, %c0_i32, %arg1 : i32, i32, i32
  }
  func.func @transform_1(%arg0: i32, %arg1: i32) -> (i32, i32) {
    %c0_i32 = arith.constant 0 : i32
    %c0_i32_0 = arith.constant 0 : i32
    %c0_i32_1 = arith.constant 0 : i32
    return %c0_i32, %c0_i32_0 : i32, i32
  }
  func.func @transform_2(%arg0: i32, %arg1: i32) -> (i32, i32) {
    %c0_i32 = arith.constant 0 : i32
    %c0_i32_0 = arith.constant 0 : i32
    %c0_i32_1 = arith.constant 0 : i32
    return %c0_i32, %c0_i32_0 : i32, i32
  }
  func.func @transform_3(%arg0: i32, %arg1: i32) -> (i32, i32) {
    %c0_i32 = arith.constant 0 : i32
    %c0_i32_0 = arith.constant 0 : i32
    %c0_i32_1 = arith.constant 0 : i32
    return %c0_i32, %c0_i32_0 : i32, i32
  }
  func.func @transform_4(%arg0: i32, %arg1: i32) -> (i32, i32) {
    %c0_i32 = arith.constant 0 : i32
    %c0_i32_0 = arith.constant 0 : i32
    %c0_i32_1 = arith.constant 0 : i32
    return %c0_i32, %c0_i32_0 : i32, i32
  }
  func.func @transform_5(%arg0: i32, %arg1: i32) -> (i32, i32, i32) {
    %c0_i32 = arith.constant 0 : i32
    %c0_i32_0 = arith.constant 0 : i32
    %c0_i32_1 = arith.constant 0 : i32
    return %arg0, %c0_i32, %c0_i32_0 : i32, i32, i32
  }
}

</mosaic_0001>

<bundles_post_ra>
// kernel: tpu_custom_call.1
= control target key start
LH: loop header
LB: loop body
LE: loop exit
PB: predicated region body
PF: predicated region fallthrough
CT: control target
= control target key end

     0   :  { %10 = vsyncpa [#allocation7], 0  ;;  %s970_s0 = inlined_call_operand.vmem [shape: f32[2,16,32], index: 0, kind: input, shape index: {}]   ;;  %s971_s1 = inlined_call_operand.vmem [shape: f32[8,16], index: 1, kind: input, shape index: {}]   ;;  %s972_s2 = inlined_call_operand.vmem [shape: f32[8,1], index: 2, kind: input, shape index: {}]   ;;  %s973_s3 = inlined_call_operand.vmem [shape: f32[16,8], index: 3, kind: input, shape index: {}]   ;;  %s974_s4 = inlined_call_operand.vmem [shape: f32[16,1], index: 4, kind: input, shape index: {}]   ;;  %s975_s5 = inlined_call_operand.hbm [shape: f32[2,2,16], index: 5, kind: output, shape index: {}]  }
   0x1   :  { %12 = vsyncpa [#allocation7 + $0x1], 0  ;;  %s814_s18 = smov 0   ;;  %s816_s19 = smov 0  }
   0x2   :  { %s818_s20 = smov 0   ;;  %s820_s21 = smov 0  }
   0x3   :  { %s822_s22 = smov 0   ;;  %s824_s23 = smov 0  }
   0x4 LB: > { %s603_s24 = sadd.s32 4294967295, %s778_s23   ;;  %s604_s25 = sadd.s32 4294967294, %s778_s23   ;;  %s778_s23 = sphi %s824_s23, %s18_s23   ;;  %s774_s22 = sphi %s822_s22, %s982_s22   ;;  %s770_s21 = sphi %s820_s21, %s981_s21   ;;  %s766_s20 = sphi %s818_s20, %s980_s20   ;;  %s762_s19 = sphi %s816_s19, %s979_s19   ;;  %s758_s18 = sphi %s814_s18, %s978_s18  }
   0x5   : > { %s30_s26 = sadd.s32 1, %s774_s22  ;;  %s149_s27 = sadd.s32 1, %s766_s20 }
   0x6   : > { %p32_p0 = scmp.ge.s32.totalorder %s30_s26, 2  ;;  %p159_p1 = scmp.ne.s32.totalorder %s766_s20, %s762_s19 }
   0x7   : > { %p160_p2 = scmp.eq.s32.totalorder %s603_s24, 1  ;;  %p165_p3 = scmp.ne.s32.totalorder %s762_s19, %s758_s18 }
   0x8   : > { %s984_s26 = smov (%p32_p0, %s30_s26), 0  ;;  %p166_p5 = scmp.eq.s32.totalorder %s604_s25, 1 }
   0x9   : > { %p854_p4 = por %p160_p2, %p159_p1  ;;  %s146_s29 = ssub.s32 %s774_s22, %s984_s26 }
   0xa   : > { %p607_p6 = scmp.ge.s32.totalorder %s778_s23, 1  ;;  %p147_p7 = scmp.eq.s32.totalorder %s146_s29, 0 }
   0xb   : > { %p861_p8 = por %p166_p5, %p165_p3  ;;  %p207_p9 = scmp.lt.s32.totalorder %s778_s23, 3 }
   0xc   : > { %s867_s6 = scalar_select %p147_p7, %s766_s20, %s149_s27  }
   0xd   : > { %p208_p10 = pnand %p607_p6, %p207_p9 }
   0xe   : > { %p238_p11 = scmp.lt.s32.totalorder (!%p208_p10), %s770_s21, 1  ;;  %s615_s12 = sshll.u32 (!%p208_p10), %s770_s21, 1 }
   0xf   : > { %211 = sbr.rel (%p208_p10) target bundleno = 988 (0x3dc), region = 40  ;;  %s525_s15 = scalar_lea.hbm (!%p208_p10), %s975_s5, %s615_s12 }
  0x10   : > { %s529_s24 = sshll.u32 (!%p208_p10), %s525_s15, 4  ;;  %s720_s8 = scalar_lea.hbm (!%p208_p10), %s975_s5, 4  ;;  %s530_s24 = int_to_ptr.hbm [resolvable:$true] %s529_s24 }
  0x11   : > { %s714_s27 = sshra.s32 (!%p208_p10), %s530_s24, 4  ;;  %s715_s27 = int_to_ptr.hbm [resolvable:$true] %s714_s27 }
  0x12   : > { %s716_s29 = scalar_lea.hbm (!%p208_p10), %s715_s27, 2  ;;  %p721_p1 = scmp.lt.s32.totalorder (!%p208_p10), %s715_s27, %s975_s5 }
  0x13   : > { %p717_p12 = scmp.ne.s32.totalorder (!%p208_p10), %s715_s27, %s716_s29  ;;  %p722_p2 = scmp.lt.s32.totalorder (!%p208_p10), %s720_s8, %s716_s29 }
  0x14   : > { %v262_v0 = vld [vmem:[%s972_s2] sm:$0xff]  ;;  %v780_v1 = vmov 0   ;;  %s239_s9 = scalar_select %p238_p11, %s770_s21, 1  ;;  %vm272_vm0 = vcmask 130048   ;;  %v266_v6 = vld [vmem:[%s974_s4 + $0x8] sm:$0xff]  ;;  %vm307_vm1 = vcmask 64512  }
  0x15   : > { %679 = vset.pattern.permute.xlu0 %v780_v1  ;;  %680 = vset.pattern.permute.xlu1 %v780_v1  ;;  %v261_v4 = vld [vmem:[%s971_s1] sm:$0xff]  ;;  %v264_v11 = vld [vmem:[%s973_s3 + $0x8] sm:$0xff]  ;;  %vm250_vm2 = vcmask 7168   ;;  %v781_v13 = vmov -inf   ;;  %vm339_vm3 = vcmask 261120   ;;  %v782_v22 = vmov 0.0   ;;  %p718_p13 = pnand %p717_p12, %p854_p4  ;;  %p723_p3 = por %p722_p2, %p721_p1 }
  0x16   : > { %269 = vperm.xlu0 %679, %v262_v0   ;;  %681 = vset.pattern.permute.xlu2 %v780_v1  ;;  %s618_s10 = sshll.u32 %s239_s9, 4  ;;  %v265_v5 = vld [vmem:[%s974_s4] sm:$0xff]  ;;  %251 = vst.msk [vmem:[#allocation2] sm:$0xff] %vm250_vm2, %v781_v13  ;;  %s783_s9 = smov 1   ;;  %vm512_vm8 = vcmask 123904  }
  0x17   : > { %s245_s13 = scalar_lea.vmem %s970_s0, %s618_s10  ;;  %304 = vperm.xlu1 %680, %v266_v6   ;;  %v263_v10 = vld [vmem:[%s973_s3] sm:$0xff]  ;;  %252 = vst.msk [vmem:[#allocation2 + $0x8] sm:$0xff] %vm250_vm2, %v781_v13  ;;  %s235_s10 = sand.u32 1, %s762_s19  }
  0x18   : > { %v877_v2 = vld [vmem:[%s245_s13 + $0x8] sm:$0xff]  ;;  %v879_v3 = vld [vmem:[%s245_s13] sm:$0xff]  ;;  %253 = vst.msk [vmem:[#allocation3] sm:$0xff] %vm250_vm2, %v782_v22  ;;  %s608_s11 = sshll.u32 %s235_s10, 1  ;;  %s515_s25 = scalar_lea.sflag [#allocation7], %s235_s10 }
  0x19   : > { %290 = vmatpush.msra.mxu0 %v877_v2  ;;  %254 = vst.msk [vmem:[#allocation3 + $0x8] sm:$0xff] %vm250_vm2, %v782_v22  ;;  %s237_s16 = scalar_lea.vmem [#allocation6], %s608_s11  ;;  %p719_p0 = pneg %p718_p13 }
  0x1a   : > { %255 = vst.msk [vmem:[#allocation4] sm:$0xff] %vm250_vm2, %v782_v22  ;;  %s527_s17 = sshll.u32 %s237_s16, 4  ;;  %s528_s17 = int_to_ptr.vmem [resolvable:$true] %s527_s17 }
  0x1b   : > { %291 = vmatpush.msra.mxu0 %v879_v3  ;;  %256 = vst.msk [vmem:[#allocation4 + $0x8] sm:$0xff] %vm250_vm2, %v782_v22  ;;  %p724_p5 = pnand %p723_p3, %p719_p0 }
  0x1c   : > { %611 = vmatmul.msk.f32.vlgmr.msra.gmra.mxu0 %vm272_vm0, %v261_v4  ;;  %257 = vst.msk [vmem:[#allocation5] sm:$0xff] %vm250_vm2, %v782_v22 }
  0x1d   : > { %258 = vst.msk [vmem:[#allocation5 + $0x8] sm:$0xff] %vm250_vm2, %v782_v22  ;;  %v337_v23 = vld [vmem:[#allocation2] sm:$0xff] }
  0x1e   : > { %299 = vperm.xlu0 %679, %v265_v5   ;;  %v338_v27 = vld [vmem:[#allocation2 + $0x8] sm:$0xff] }
  0x1f   : > { %v372_v51 = vld [vmem:[#allocation3] sm:$0xff] }
  0x21   : > { %v387_v52 = vld [vmem:[#allocation4] sm:$0xff] }
  0x23   : > { %v401_v59 = vld [vmem:[#allocation5] sm:$0xff] }
  0x88   : > { %v270_v7 = vpop.permute.xlu0 %269 }
  0x89   : > { %v305_v18 = vpop.permute.xlu1 %304 }
  0x90   : > { %v300_v14 = vpop.permute.xlu0 %299 }
  0x99   : > { %v293_v8 = vpop.f32.mrf.mxu0 }
  0x9a   : > { %v294_v9 = vadd.f32 %v293_v8, %v270_v7 }
  0x9c   : > { %682 = vtanh.f32 %v294_v9  ;;  %v373_v9 = vld [vmem:[#allocation3 + $0x8] sm:$0xff] }
  0xa2   : > { %v683_v12 = vpop.eup %682 }
  0xa3   : > { %329 = vmatpush.msra.mxu1 %v683_v12  ;;  %619 = vmatpush.msra.mxu2 %v683_v12  ;;  %v388_v12 = vld [vmem:[#allocation4 + $0x8] sm:$0xff] }
  0xa4   : > { %612 = vmatmul.msk.f32.vlgmr.msra.gmra.mxu1 %vm307_vm1, %v263_v10  ;;  %613 = vmatmul.msk.f32.vlgmr.msra.gmra.mxu2 %vm307_vm1, %v264_v11 }
 0x121   : > { %v331_v15 = vpop.f32.mrf.mxu1 }
 0x122   : > { %v332_v16 = vadd.f32 %v331_v15, %v300_v14 }
 0x124   : > { %v340_v17 = vsel %vm339_vm3, %v332_v16, -inf }
 0x125   : > { %341 = vmax.xlane.f32.xlu1 %v340_v17 }
 0x127   : > { %v334_v19 = vpop.f32.mrf.mxu2 }
 0x128   : > { %v335_v20 = vadd.f32 %v334_v19, %v305_v18 }
 0x12a   : > { %v343_v21 = vsel %vm339_vm3, %v335_v20, -inf }
 0x12b   : > { %344 = vmax.xlane.f32.xlu2 %v343_v21 }
 0x198   : > { %v342_v24 = vpop.xlane.xlu1 %341 }
 0x199   : > { %v346_v25 = vmax.f32 %v337_v23, %v342_v24 }
 0x19b   : > { %v348_v26 = vsub.f32 %v337_v23, %v346_v25  ;;  %417 = vst.msk [vmem:[#allocation2] sm:$0xff] %vm250_vm2, %v346_v25  ;;  %356 = vperm.xlu2 %681, %v346_v25  }
 0x19d   : > { %v350_v49 = vmul.f32 1.442695, %v348_v26 }
 0x19e   : > { %v345_v28 = vpop.xlane.xlu2 %344 }
 0x19f   : > { %v347_v29 = vmax.f32 %v338_v27, %v345_v28 }
 0x1a1   : > { %v349_v30 = vsub.f32 %v338_v27, %v347_v29  ;;  %418 = vst.msk [vmem:[#allocation2 + $0x8] sm:$0xff] %vm250_vm2, %v347_v29  ;;  %361 = vperm.xlu0 %679, %v347_v29  }
 0x1a3   : > { %v352_v0 = vmul.f32 1.442695, %v349_v30 }
 0x1f5   : > { %v357_v31 = vpop.permute.xlu2 %356 }
 0x1f6   : > { %v364_v32 = vsub.f32 %v332_v16, %v357_v31  ;;  %v402_v16 = vld [vmem:[#allocation5 + $0x8] sm:$0xff] }
 0x1f8   : > { %v366_v33 = vmul.f32 1.442695, %v364_v32 }
 0x1fa   : > { %684 = vpow2.f32 %v366_v33 }
 0x200   : > { %v685_v34 = vpop.eup %684 }
 0x201   : > { %v376_v35 = vsel %vm339_vm3, %v685_v34, 0.0  ;;  %v370_v36 = vmul.f32 %v685_v34, %v879_v3 }
 0x202   : > { %377 = vadd.xlane.f32.xlu0 %v376_v35 }
 0x203   : > { %v391_v37 = vsel %vm339_vm3, %v370_v36, 0.0  ;;  %v405_v38 = vmul.f32 %v370_v36, %v879_v3 }
 0x204   : > { %392 = vadd.xlane.f32.xlu1 %v391_v37 }
 0x205   : > { %v407_v39 = vsel %vm339_vm3, %v405_v38, 0.0 }
 0x20c   : > { %408 = vadd.xlane.f32.xlu1 %v407_v39 }
 0x213   : > { %v362_v40 = vpop.permute.xlu0 %361 }
 0x214   : > { %v365_v41 = vsub.f32 %v335_v20, %v362_v40 }
 0x216   : > { %v368_v42 = vmul.f32 1.442695, %v365_v41 }
 0x218   : > { %686 = vpow2.f32 %v368_v42 }
 0x219   : > { %688 = vpow2.f32 %v350_v49 }
 0x21e   : > { %v687_v43 = vpop.eup %686 }
 0x21f   : > { %v379_v44 = vsel %vm339_vm3, %v687_v43, 0.0  ;;  %v371_v45 = vmul.f32 %v687_v43, %v877_v2  ;;  %v689_v50 = vpop.eup %688 }
 0x220   : > { %380 = vadd.xlane.f32.xlu2 %v379_v44  ;;  %v374_v53 = vmul.f32 %v689_v50, %v372_v51  ;;  %v389_v56 = vmul.f32 %v689_v50, %v387_v52  ;;  %v403_v60 = vmul.f32 %v689_v50, %v401_v59 }
 0x221   : > { %v394_v46 = vsel %vm339_vm3, %v371_v45, 0.0  ;;  %v406_v47 = vmul.f32 %v371_v45, %v877_v2 }
 0x222   : > { %395 = vadd.xlane.f32.xlu0 %v394_v46 }
 0x223   : > { %v410_v48 = vsel %vm339_vm3, %v406_v47, 0.0 }
 0x224   : > { %411 = vadd.xlane.f32.xlu1 %v410_v48 }
 0x275   : > { %v378_v54 = vpop.xlane.xlu0 %377 }
 0x276   : > { %v382_v55 = vadd.f32 %v378_v54, %v374_v53 }
 0x277   : > { %v393_v57 = vpop.xlane.xlu1 %392 }
 0x278   : > { %385 = vst.msk [vmem:[#allocation3] sm:$0xff] %vm250_vm2, %v382_v55  ;;  %v397_v58 = vadd.f32 %v393_v57, %v389_v56 }
 0x27a   : > { %399 = vst.msk [vmem:[#allocation4] sm:$0xff] %vm250_vm2, %v397_v58 }
 0x27f   : > { %v409_v61 = vpop.xlane.xlu1 %408  ;;  %v422_v62 = vld [vmem:[#allocation3] sm:$0xff] }
 0x280   : > { %v413_v63 = vadd.f32 %v409_v61, %v403_v60  ;;  %690 = vrcp.f32 %v422_v62 }
 0x281   : > { %692 = vpow2.f32 %v352_v0  ;;  %v432_v5 = vld [vmem:[#allocation4] sm:$0xff] }
 0x282   : > { %415 = vst.msk [vmem:[#allocation5] sm:$0xff] %vm250_vm2, %v413_v63 }
 0x286   : > { %v691_v1 = vpop.eup %690 }
 0x287   : > { %v426_v2 = vmul.f32 %v691_v1, %v422_v62  ;;  %v693_v8 = vpop.eup %692 }
 0x288   : > { %v375_v14 = vmul.f32 %v693_v8, %v373_v9  ;;  %v390_v19 = vmul.f32 %v693_v8, %v388_v12  ;;  %v404_v22 = vmul.f32 %v693_v8, %v402_v16 }
 0x289   : > { %v428_v3 = vsub.f32 2.0, %v426_v2  ;;  %v436_v7 = vld [vmem:[#allocation5] sm:$0xff] }
 0x28b   : > { %v430_v4 = vmul.f32 %v691_v1, %v428_v3 }
 0x28d   : > { %v923_v6 = vmul.f32 %v432_v5, %v430_v4  ;;  %v438_v10 = vmul.f32 %v436_v7, %v430_v4 }
 0x28f   : > { %v440_v11 = vmul.f32 %v923_v6, %v923_v6 }
 0x291   : > { %v442_v13 = vsub.f32 %v438_v10, %v440_v11 }
 0x293   : > { %v381_v15 = vpop.xlane.xlu2 %380  ;;  %v444_v17 = vmax.f32 %v442_v13, 1e-07 }
 0x294   : > { %v383_v18 = vadd.f32 %v381_v15, %v375_v14 }
 0x295   : > { %v396_v20 = vpop.xlane.xlu0 %395  ;;  %694 = vrsqrt.f32 %v444_v17  ;;  %vm453_vm4 = vcmp.eq.f32.partialorder %v444_v17, inf  ;;  %v456_v35 = vand.u32 2147483648, %v444_v17  ;;  %vm455_vm5 = vcmp.eq.f32.partialorder %v444_v17, 0.0 }
 0x296   : > { %386 = vst.msk [vmem:[#allocation3 + $0x8] sm:$0xff] %vm250_vm2, %v383_v18  ;;  %v398_v21 = vadd.f32 %v396_v20, %v390_v19 }
 0x297   : > { %v412_v23 = vpop.xlane.xlu1 %411 }
 0x298   : > { %400 = vst.msk [vmem:[#allocation4 + $0x8] sm:$0xff] %vm250_vm2, %v398_v21  ;;  %v414_v24 = vadd.f32 %v412_v23, %v404_v22 }
 0x29a   : > { %416 = vst.msk [vmem:[#allocation5 + $0x8] sm:$0xff] %vm250_vm2, %v414_v24 }
 0x29b   : > { %v695_v25 = vpop.eup %694 }
 0x29c   : > { %v447_v26 = vmul.f32 %v695_v25, %v444_v17 }
 0x29d   : > { %v423_v27 = vld [vmem:[#allocation3 + $0x8] sm:$0xff] }
 0x29e   : > { %v448_v28 = vmul.f32 %v695_v25, %v447_v26  ;;  %696 = vrcp.f32 %v423_v27 }
 0x29f   : > { %v433_v40 = vld [vmem:[#allocation4 + $0x8] sm:$0xff] }
 0x2a0   : > { %v449_v29 = vmul.f32 0.5, %v448_v28 }
 0x2a1   : > { %v437_v42 = vld [vmem:[#allocation5 + $0x8] sm:$0xff] }
 0x2a2   : > { %v450_v30 = vsub.f32 1.5, %v449_v29 }
 0x2a4   : > { %v697_v31 = vpop.eup %696  ;;  %v451_v32 = vmul.f32 %v695_v25, %v450_v30 }
 0x2a5   : > { %v427_v33 = vmul.f32 %v697_v31, %v423_v27 }
 0x2a6   : > { %v452_v34 = vmul.f32 %v451_v32, %v444_v17 }
 0x2a7   : > { %v429_v36 = vsub.f32 2.0, %v427_v33 }
 0x2a8   : > { %v454_v37 = vsel %vm453_vm4, %v444_v17, %v452_v34 }
 0x2a9   : > { %v457_v38 = vsel %vm455_vm5, %v456_v35, %v454_v37  ;;  %v431_v39 = vmul.f32 %v697_v31, %v429_v36 }
 0x2aa   : > { %472 = vrot.lane.b32.xlu2 %v457_v38, %s783_s9 }
 0x2ab   : > { %v435_v41 = vmul.f32 %v433_v40, %v431_v39  ;;  %v439_v43 = vmul.f32 %v437_v42, %v431_v39 }
 0x2ad   : > { %v441_v44 = vmul.f32 %v435_v41, %v435_v41 }
 0x2af   : > { %v443_v45 = vsub.f32 %v439_v43, %v441_v44 }
 0x2b1   : > { %v445_v46 = vmax.f32 %v443_v45, 1e-07 }
 0x2b3   : > { %698 = vrsqrt.f32 %v445_v46  ;;  %vm465_vm6 = vcmp.eq.f32.partialorder %v445_v46, inf  ;;  %v468_v54 = vand.u32 2147483648, %v445_v46  ;;  %vm467_vm7 = vcmp.eq.f32.partialorder %v445_v46, 0.0 }
 0x2b9   : > { %v699_v47 = vpop.eup %698 }
 0x2ba   : > { %v459_v48 = vmul.f32 %v699_v47, %v445_v46 }
 0x2bc   : > { %v460_v49 = vmul.f32 %v699_v47, %v459_v48 }
 0x2be   : > { %v461_v50 = vmul.f32 0.5, %v460_v49 }
 0x2c0   : > { %v462_v51 = vsub.f32 1.5, %v461_v50 }
 0x2c2   : > { %v463_v52 = vmul.f32 %v699_v47, %v462_v51 }
 0x2c4   : > { %v464_v53 = vmul.f32 %v463_v52, %v445_v46 }
 0x2c6   : > { %v466_v55 = vsel %vm465_vm6, %v445_v46, %v464_v53 }
 0x2c7   : > { %v469_v56 = vsel %vm467_vm7, %v468_v54, %v466_v55 }
 0x2c8   : > { %474 = vrot.lane.b32.xlu0 %v469_v56, %s783_s9 }
 0x304   : > { %v473_v57 = vpop.permute.xlu2 %472 }
 0x305   : > { %v478_v58 = vsel %vm250_vm2, %v923_v6, %v473_v57 }
 0x306   : > { %480 = vxpose.xlu1.b32.start [1/2] (short) (narrow) %v478_v58, 8 }
 0x33a   : > { %v475_v59 = vpop.permute.xlu0 %474 }
 0x33b   : > { %v479_v60 = vsel %vm250_vm2, %v435_v41, %v475_v59 }
 0x33c   : > { %481 = vxpose.xlu1.b32.end [2/2] (short) (narrow) %v479_v60, 8 }
 0x3d8   : > { %v496_v61 = vpop.trf.xlu1 }
 0x3d9   : > { %513 = vst.msk [vmem:[%s237_s16] sm:$0x3] %vm512_vm8, %v496_v61 }
 0x3da   : > { %727 = shalt.err (!%p724_p5)
}
 0x3db   : > { %620 = dma.vmem_to_hbm [thread:$0]  (%p854_p4), %s528_s17, 32, %s530_s24, %s515_s25  }
 0x3dc PF: > { %p626_p6 = scmp.ge.s32.totalorder %s778_s23, 2  ;;  %s541_s10 = sand.u32 1, %s758_s18  }
 0x3dd   : > { %s542_s12 = scalar_lea.sflag [#allocation7], %s541_s10 }
 0x3de   : > { %p623_p7 = pnand %p626_p6, %p861_p8 }
 0x3e0   : > { %p624_p9 = pneg %p623_p7 }
 0x3e2   : > { %753 = dma.done.wait (%p624_p9), %s542_s12, 32  }
 0x3e3   : > { %755 = vsyncadd (%p624_p9), %s542_s12, 4294967264  ;;  %s18_s23 = sadd.s32 1, %s778_s23   ;;  %s978_s18 = smov %s762_s19 }
 0x3e4   : > { %p15_p10 = scmp.ge.s32.totalorder %s18_s23, 4   ;;  %s979_s19 = smov %s766_s20 }
 0x3e5   : > { %s980_s20 = smov %s867_s6  ;;  %s981_s21 = smov %s774_s22 }
 0x3e6   : > { %s982_s22 = smov %s984_s26  ;;  %17 = sbr.rel (!%p15_p10) target bundleno = 4 (0x4), region = 83 }
 0x3eb   :  { %548 = vsyncpa [#allocation7], 1 }
 0x3ec   :  { %550 = vsyncpa [#allocation7 + $0x1], 1 }

</bundles_post_ra>
